<compile_context>
chip_gen: v6e
topology: v6e:2x2x1
jax: 0.10.0
libtpu: 0.0.40
codegen_flags: <defaults>
</compile_context>

<pallas_src>
import jax
import jax.numpy as jnp
from jax.experimental import pallas as pl
from jax.experimental.pallas import tpu as pltpu

VMEM_LIMIT = 32 * 1024 * 1024       # explicit scoped-VMEM limit (safe on v5e/v6e/v7x)
VMEM_TILE_BUDGET = 20 * 1024 * 1024  # what the double-buffered tiles may consume
MAX_LANE_TILE = 2048


def _pick_lane_tile(hw, cin, cout):
    """Pick the lane-tile size TM (multiple of 128) and the padded HW extent.

    Prefers the largest TM that divides hw exactly (avoids any pad copy),
    capped by the VMEM budget for double-buffered (Cin + Cout) x TM f32 tiles.
    """
    bytes_per_lane = 2 * (cin + cout) * 4  # x + out tiles, double-buffered, f32
    cap = (VMEM_TILE_BUDGET // bytes_per_lane) // 128 * 128
    cap = max(128, min(MAX_LANE_TILE, cap))
    best = None
    t = 128
    while t <= min(cap, hw):
        if hw % t == 0:
            best = t
        t += 128
    if best is not None:
        return best, hw
    t = max(128, min(cap, ((hw + 127) // 128) * 128))
    hwp = ((hw + t - 1) // t) * t
    return t, hwp


def _conv_tile(w, x):
    """(Cout, Cin) @ (Cin, TM) -> (Cout, TM) in f32."""
    cout, cin = w.shape
    if cin <= 32:
        # Tiny K: do Cin broadcast-FMAs on the VPU; the kernel is memory-bound
        # and a K=4, M=8 matmul would use <1% of an MXU tile.
        acc = w[:, 0:1] * x[0:1, :]
        for c in range(1, cin):
            acc = acc + w[:, c:c + 1] * x[c:c + 1, :]
        return acc.astype(jnp.float32)
    return jnp.dot(w, x, preferred_element_type=jnp.float32)


def _stats_kernel(x_ref, w_ref, s_ref):
    """Per-tile per-channel sum / sum-of-squares of the conv output.

    x_ref: (1, Cin, TM), w_ref: (Cout, Cin), s_ref: (1, 1, Cout, 2).
    Zero-padded lane columns give y == 0 (no conv bias), so they contribute
    nothing to either sum; the true element count is used as divisor outside.
    """
    x = x_ref[0]                              # (Cin, TM)
    y = _conv_tile(w_ref[...], x)             # (Cout, TM) f32
    s_ref[0, 0, :, 0:1] = jnp.sum(y, axis=1, keepdims=True)
    s_ref[0, 0, :, 1:2] = jnp.sum(y * y, axis=1, keepdims=True)


def _conv_bn_relu_kernel(x_ref, w_ref, scale_ref, bias_ref, o_ref):
    """Recompute the 1x1 conv tile, apply folded BN affine, ReLU, store."""
    x = x_ref[0]                              # (Cin, TM)
    y = _conv_tile(w_ref[...], x)             # (Cout, TM) f32
    y = y * scale_ref[...] + bias_ref[...]    # (Cout, 1) broadcasts over lanes
    o_ref[0] = jnp.maximum(y, 0.0).astype(o_ref.dtype)


def conv1x1_bn_relu(x, weight, gamma, beta, *, stride=1, eps=1e-5):
    """x: (N, Cin, H, W) NCHW float32; weight: (Cout, Cin) (1x1 kernel squeezed)."""
    # TODO(synk): groups > 1 not implemented (module default groups=1).
    if stride != 1:
        x = x[:, :, ::stride, ::stride]
    N, Cin, H, W = x.shape
    Cout = weight.shape[0]
    HW = H * W
    M = N * HW  # true element count per channel for the BN statistics

    # NCHW is already channel-major: a pure reshape, no transpose / HBM shuffle.
    x32 = x.astype(jnp.float32).reshape(N, Cin, HW)
    w = weight.astype(jnp.float32)            # (Cout, Cin)

    TM, HWp = _pick_lane_tile(HW, Cin, Cout)
    if HWp != HW:
        # Zero-padded lanes produce zero conv output -> BN sums unaffected.
        x32 = jnp.pad(x32, ((0, 0), (0, 0), (0, HWp - HW)))
    n_m = HWp // TM
    grid = (N, n_m)

    # Pass 1: stats only (per-tile partials -> fully parallel grid, megacore-safe).
    partial = pl.pallas_call(
        _stats_kernel,
        out_shape=jax.ShapeDtypeStruct((N, n_m, Cout, 2), jnp.float32),
        grid_spec=pltpu.PrefetchScalarGridSpec(
            num_scalar_prefetch=0,
            grid=grid,
            in_specs=[pl.BlockSpec((1, Cin, TM), lambda n, m: (n, 0, m)),
                      pl.BlockSpec((Cout, Cin), lambda n, m: (0, 0))],
            out_specs=pl.BlockSpec((1, 1, Cout, 2), lambda n, m: (n, m, 0, 0))),
        compiler_params=pltpu.CompilerParams(
            dimension_semantics=("parallel", "parallel"),
            vmem_limit_bytes=VMEM_LIMIT),
    )(x32, w)

    # Tiny final reduction + BN fold in XLA.
    s = jnp.sum(partial, axis=(0, 1))                      # (Cout, 2)
    mean = s[:, 0] / M
    var = jnp.maximum(s[:, 1] / M - mean * mean, 0.0)      # clamp: E[y^2]-mean^2 may cancel
    scale = gamma.astype(jnp.float32) / jnp.sqrt(var + eps)
    bias = beta.astype(jnp.float32) - mean * scale

    # Pass 2: conv recompute + folded BN + ReLU, lane-dense (Cout, TM) stores.
    out = pl.pallas_call(
        _conv_bn_relu_kernel,
        out_shape=jax.ShapeDtypeStruct((N, Cout, HWp), jnp.float32),
        grid_spec=pltpu.PrefetchScalarGridSpec(
            num_scalar_prefetch=0,
            grid=grid,
            in_specs=[pl.BlockSpec((1, Cin, TM), lambda n, m: (n, 0, m)),
                      pl.BlockSpec((Cout, Cin), lambda n, m: (0, 0)),
                      pl.BlockSpec((Cout, 1), lambda n, m: (0, 0)),
                      pl.BlockSpec((Cout, 1), lambda n, m: (0, 0))],
            out_specs=pl.BlockSpec((1, Cout, TM), lambda n, m: (n, 0, m))),
        compiler_params=pltpu.CompilerParams(
            dimension_semantics=("parallel", "parallel"),
            vmem_limit_bytes=VMEM_LIMIT),
    )(x32, w, scale.reshape(Cout, 1), bias.reshape(Cout, 1))

    if HWp != HW:
        out = out[:, :, :HW]
    return out.reshape(N, Cout, H, W)


def _reference(x, weight, gamma, beta, eps=1e-5):
    """Pure-JAX reference matching PyTorch Conv1x1.forward (training-mode BN)."""
    y = jnp.einsum("nchw,oc->nohw", x.astype(jnp.float32), weight.astype(jnp.float32))
    mean = jnp.mean(y, axis=(0, 2, 3), keepdims=True)
    var = jnp.mean((y - mean) ** 2, axis=(0, 2, 3), keepdims=True)  # biased
    yhat = (y - mean) / jnp.sqrt(var + eps)
    yhat = yhat * gamma.reshape(1, -1, 1, 1) + beta.reshape(1, -1, 1, 1)
    return jnp.maximum(yhat, 0.0)


if __name__ == "__main__":
    in_channels, out_channels = 4, 8
    N, H, W = 2, 16, 16

    key = jax.random.PRNGKey(0)
    kx, kw, kg, kb = jax.random.split(key, 4)
    x = jax.random.normal(kx, (N, in_channels, H, W), dtype=jnp.float32)
    # Conv2d(in, out, 1, bias=False) weight shape: (out, in, 1, 1) -> squeeze to (out, in)
    weight = jax.random.normal(kw, (out_channels, in_channels), dtype=jnp.float32) * 0.5
    # BatchNorm2d affine params (PyTorch init: gamma=1, beta=0; perturb deterministically)
    gamma = 1.0 + 0.1 * jax.random.normal(kg, (out_channels,), dtype=jnp.float32)
    beta = 0.1 * jax.random.normal(kb, (out_channels,), dtype=jnp.float32)

    out = conv1x1_bn_relu(x, weight, gamma, beta)
    out = jax.block_until_ready(out)

    ref = _reference(x, weight, gamma, beta)
    assert out.shape == (N, out_channels, H, W)
    assert jnp.allclose(out, ref, atol=1e-4, rtol=1e-4), "mismatch vs reference"
    print("KERNEL_OK")
</pallas_src>

<mosaic_0001>
module attributes {stable_mosaic.version = 11 : i64} {
  func.func @_stats_kernel(%arg0: i32, %arg1: i32, %arg2: memref<1x4x256xf32, #tpu.memory_space<vmem>>, %arg3: memref<8x4xf32, #tpu.memory_space<vmem>>, %arg4: memref<1x1x8x2xf32, #tpu.memory_space<vmem>>) attributes {dimension_semantics = [#tpu.dimension_semantics<parallel>, #tpu.dimension_semantics<parallel>], iteration_bounds = array<i64: 2, 1>, scalar_prefetch = 0 : i64, scratch_operands = 0 : i64, tpu.core_type = #tpu.core_type<tc>, window_params = [{transform_indices = @transform_0, window_bounds = array<i64: 1, 4, 256>}, {pipeline_mode = #tpu.pipeline_mode<synchronous>, transform_indices = @transform_1, window_bounds = array<i64: 8, 4>}, {transform_indices = @transform_2, window_bounds = array<i64: 1, 1, 8, 2>}]} {
    %c0 = arith.constant 0 : index
    %c0_0 = arith.constant 0 : index
    %c0_1 = arith.constant 0 : index
    %0 = vector.load %arg2[%c0, %c0_0, %c0_1] : memref<1x4x256xf32, #tpu.memory_space<vmem>>, vector<1x4x256xf32>
    %1 = vector.shape_cast %0 : vector<1x4x256xf32> to vector<4x256xf32>
    %c0_2 = arith.constant 0 : index
    %c0_3 = arith.constant 0 : index
    %2 = vector.load %arg3[%c0_2, %c0_3] : memref<8x4xf32, #tpu.memory_space<vmem>>, vector<8x4xf32>
    %3 = vector.extract_strided_slice %2 {offsets = [0, 0], sizes = [8, 1], strides = [1, 1]} : vector<8x4xf32> to vector<8x1xf32>
    %4 = vector.extract_strided_slice %1 {offsets = [0, 0], sizes = [1, 256], strides = [1, 1]} : vector<4x256xf32> to vector<1x256xf32>
    %5 = vector.broadcast %3 : vector<8x1xf32> to vector<8x256xf32>
    %6 = vector.broadcast %4 : vector<1x256xf32> to vector<8x256xf32>
    %7 = arith.mulf %5, %6 : vector<8x256xf32>
    %8 = vector.extract_strided_slice %2 {offsets = [0, 1], sizes = [8, 1], strides = [1, 1]} : vector<8x4xf32> to vector<8x1xf32>
    %9 = vector.extract_strided_slice %1 {offsets = [1, 0], sizes = [1, 256], strides = [1, 1]} : vector<4x256xf32> to vector<1x256xf32>
    %10 = vector.broadcast %8 : vector<8x1xf32> to vector<8x256xf32>
    %11 = vector.broadcast %9 : vector<1x256xf32> to vector<8x256xf32>
    %12 = arith.mulf %10, %11 : vector<8x256xf32>
    %13 = arith.addf %7, %12 : vector<8x256xf32>
    %14 = vector.extract_strided_slice %2 {offsets = [0, 2], sizes = [8, 1], strides = [1, 1]} : vector<8x4xf32> to vector<8x1xf32>
    %15 = vector.extract_strided_slice %1 {offsets = [2, 0], sizes = [1, 256], strides = [1, 1]} : vector<4x256xf32> to vector<1x256xf32>
    %16 = vector.broadcast %14 : vector<8x1xf32> to vector<8x256xf32>
    %17 = vector.broadcast %15 : vector<1x256xf32> to vector<8x256xf32>
    %18 = arith.mulf %16, %17 : vector<8x256xf32>
    %19 = arith.addf %13, %18 : vector<8x256xf32>
    %20 = vector.extract_strided_slice %2 {offsets = [0, 3], sizes = [8, 1], strides = [1, 1]} : vector<8x4xf32> to vector<8x1xf32>
    %21 = vector.extract_strided_slice %1 {offsets = [3, 0], sizes = [1, 256], strides = [1, 1]} : vector<4x256xf32> to vector<1x256xf32>
    %22 = vector.broadcast %20 : vector<8x1xf32> to vector<8x256xf32>
    %23 = vector.broadcast %21 : vector<1x256xf32> to vector<8x256xf32>
    %24 = arith.mulf %22, %23 : vector<8x256xf32>
    %25 = arith.addf %19, %24 : vector<8x256xf32>
    %cst = arith.constant dense<0.000000e+00> : vector<8xf32>
    %26 = vector.multi_reduction <add>, %25, %cst [1] : vector<8x256xf32> to vector<8xf32>
    %27 = vector.shape_cast %26 : vector<8xf32> to vector<8x1xf32>
    %c0_4 = arith.constant 0 : index
    %c0_5 = arith.constant 0 : index
    %c0_6 = arith.constant 0 : index
    %c0_7 = arith.constant 0 : index
    %28 = vector.load %arg4[%c0_4, %c0_5, %c0_6, %c0_7] : memref<1x1x8x2xf32, #tpu.memory_space<vmem>>, vector<1x1x8x1xf32>
    %29 = vector.shape_cast %28 : vector<1x1x8x1xf32> to vector<8x1xf32>
    %30 = vector.shape_cast %27 : vector<8x1xf32> to vector<1x1x8x1xf32>
    tpu.vector_store %arg4[%c0_4, %c0_5, %c0_6, %c0_7], %30 {strides = array<i32>} : memref<1x1x8x2xf32, #tpu.memory_space<vmem>>, vector<1x1x8x1xf32>,
    %31 = arith.mulf %25, %25 : vector<8x256xf32>
    %cst_8 = arith.constant dense<0.000000e+00> : vector<8xf32>
    %32 = vector.multi_reduction <add>, %31, %cst_8 [1] : vector<8x256xf32> to vector<8xf32>
    %33 = vector.shape_cast %32 : vector<8xf32> to vector<8x1xf32>
    %c0_9 = arith.constant 0 : index
    %c0_10 = arith.constant 0 : index
    %c0_11 = arith.constant 0 : index
    %c1 = arith.constant 1 : index
    %34 = vector.load %arg4[%c0_9, %c0_10, %c0_11, %c1] : memref<1x1x8x2xf32, #tpu.memory_space<vmem>>, vector<1x1x8x1xf32>
    %35 = vector.shape_cast %34 : vector<1x1x8x1xf32> to vector<8x1xf32>
    %36 = vector.shape_cast %33 : vector<8x1xf32> to vector<1x1x8x1xf32>
    tpu.vector_store %arg4[%c0_9, %c0_10, %c0_11, %c1], %36 {strides = array<i32>} : memref<1x1x8x2xf32, #tpu.memory_space<vmem>>, vector<1x1x8x1xf32>,
    return
  }
  func.func @transform_0(%arg0: i32, %arg1: i32) -> (i32, i32, i32) {
    %c0_i32 = arith.constant 0 : i32
    %c0_i32_0 = arith.constant 0 : i32
    return %arg0, %c0_i32, %arg1 : i32, i32, i32
  }
  func.func @transform_1(%arg0: i32, %arg1: i32) -> (i32, i32) {
    %c0_i32 = arith.constant 0 : i32
    %c0_i32_0 = arith.constant 0 : i32
    %c0_i32_1 = arith.constant 0 : i32
    return %c0_i32, %c0_i32_0 : i32, i32
  }
  func.func @transform_2(%arg0: i32, %arg1: i32) -> (i32, i32, i32, i32) {
    %c0_i32 = arith.constant 0 : i32
    %c0_i32_0 = arith.constant 0 : i32
    %c0_i32_1 = arith.constant 0 : i32
    return %arg0, %arg1, %c0_i32, %c0_i32_0 : i32, i32, i32, i32
  }
}

</mosaic_0001>

<bundles_post_ra>
// kernel: tpu_custom_call.1
= control target key start
LH: loop header
LB: loop body
LE: loop exit
PB: predicated region body
PF: predicated region fallthrough
CT: control target
= control target key end

     0   :  { %7 = vsyncpa [#allocation3], 0  ;;  %s669_s0 = inlined_call_operand.hbm [shape: f32[2,4,256], index: 0, kind: input, shape index: {}]   ;;  %s670_s1 = inlined_call_operand.vmem [shape: f32[8,4], index: 1, kind: input, shape index: {}]   ;;  %s671_s2 = inlined_call_operand.vmem [shape: f32[2,1,8,2], index: 2, kind: output, shape index: {}]  }
   0x1   :  { %9 = vsyncpa [#allocation3 + $0x1], 0  ;;  %s566_s9 = smov 0   ;;  %s568_s10 = smov 0  }
   0x2   :  { %s570_s11 = smov 0   ;;  %s572_s12 = smov 0  }
   0x3   :  { %s574_s13 = smov 0   ;;  %s576_s14 = smov 0  }
   0x4 LB: > { %s389_s15 = sadd.s32 4294967295, %s544_s14   ;;  %s27_s16 = sadd.s32 1, %s540_s13  ;;  %s544_s14 = sphi %s576_s14, %s15_s14   ;;  %s540_s13 = sphi %s574_s13, %s679_s13   ;;  %s536_s12 = sphi %s572_s12, %s678_s12   ;;  %s532_s11 = sphi %s570_s11, %s677_s11   ;;  %s528_s10 = sphi %s568_s10, %s676_s10   ;;  %s524_s9 = sphi %s566_s9, %s675_s9  }
   0x5   : > { %p29_p0 = scmp.ge.s32.totalorder %s27_s16, 2  ;;  %s36_s17 = sadd.s32 1, %s532_s11 }
   0x6   : > { %p43_p1 = scmp.ne.s32.totalorder %s532_s11, %s528_s10  ;;  %p44_p2 = scmp.eq.s32.totalorder %s544_s14, 0 }
   0x7   : > { %s681_s16 = smov (%p29_p0, %s27_s16), 0  ;;  %p49_p4 = scmp.ne.s32.totalorder %s528_s10, %s524_s9 }
   0x8   : > { %p602_p3 = por %p44_p2, %p43_p1  ;;  %s31_s19 = ssub.s32 %s540_s13, %s681_s16 }
   0x9   : > { %p50_p5 = scmp.eq.s32.totalorder %s389_s15, 0  ;;  %p34_p6 = scmp.eq.s32.totalorder %s31_s19, 0 }
   0xa   : > { %p408_p8 = scmp.lt.s32.totalorder %s544_s14, 2  ;;  %s125_s22 = sand.u32 1, %s532_s11  }
   0xb   : > { %p609_p7 = por %p50_p5, %p49_p4  ;;  %s401_s23 = sshll.u32 %s540_s13, 7 }
   0xc   : > { %s615_s21 = scalar_select %p34_p6, %s532_s11, %s36_s17  }
   0xd   : > { %s393_s24 = sshll.u32 %s125_s22, 3  ;;  %s137_s27 = scalar_lea.hbm %s669_s0, %s401_s23 }
   0xe   : > { %s129_s28 = scalar_lea.vmem [#allocation2], %s393_s24  ;;  %p624_p9 = pnand %p408_p8, %p602_p3 }
   0xf   : > { %s139_s29 = sshll.u32 %s129_s28, 4  ;;  %p396_p10 = scmp.ge.s32.totalorder %s544_s14, 1  ;;  %s140_s29 = int_to_ptr.vmem [resolvable:$true] %s139_s29 }
  0x10   : > { %p144_p11 = scmp.lt.s32.totalorder %s544_s14, 3  ;;  %s126_s3 = scalar_lea.sflag [#allocation3], %s125_s22 }
  0x11   : > { %p468_p12 = pneg %p624_p9  ;;  %s479_s4 = scalar_lea.vmem %s140_s29, 128 }
  0x12   : > { %p480_p13 = scmp.ne.s32.totalorder %s140_s29, %s479_s4  ;;  %s546_s5 = smov [#allocation2]  }
  0x13   : > { %s484_s6 = sshll.u32 %s546_s5, 4  ;;  %s485_s6 = int_to_ptr.vmem [resolvable:$false] %s484_s6 }
  0x14   : > { %p482_p0 = pnand %p480_p13, %p468_p12  ;;  %s486_s7 = scalar_lea.vmem %s485_s6, 256 }
  0x15   : > { %p487_p2 = scmp.lt.s32.totalorder %s140_s29, %s485_s6  ;;  %p488_p3 = scmp.lt.s32.totalorder %s486_s7, %s479_s4 }
  0x16   : > { %p483_p1 = pneg %p482_p0 }
  0x17   : > { %p489_p4 = por %p488_p3, %p487_p2 }
  0x19   : > { %p490_p5 = pnand %p489_p4, %p483_p1 }
  0x1b   : > { %493 = shalt.err (!%p490_p5)
}
  0x1c   : > { %407 = dma.hbm_to_vmem [thread:$0]  (!%p624_p9), %s137_s27, 128, %s140_s29, %s126_s3  }
  0x1d   : > { %p145_p6 = pnand %p396_p10, %p144_p11 }
  0x1e   : > { %s150_s8 = sand.u32 (!%p145_p6), 1, %s528_s10  }
  0x1f   : > { %148 = sbr.rel (%p145_p6) target bundleno = 319 (0x13f), region = 28  ;;  %s397_s9 = sshll.u32 (!%p145_p6), %s150_s8, 3 }
  0x20   : > { %s151_s15 = scalar_lea.sflag (!%p145_p6), [#allocation3], %s150_s8  ;;  %s154_s17 = scalar_lea.vmem (!%p145_p6), [#allocation2], %s397_s9 }
  0x24   : > { %519 = dma.done.wait (%p609_p7), %s151_s15, 128  }
  0x25   : > { %521 = vsyncadd (%p609_p7), %s151_s15, 4294967168  ;;  %v547_v0 = vmov 0   ;;  %v548_v1 = vmov 2   ;;  %v186_v2 = vld [vmem:[%s670_s1] sm:$0xff]  ;;  %v549_v3 = vmov 1   ;;  %v550_v4 = vmov 3  }
  0x26   : > { %461 = vset.pattern.permute.xlu0 %v547_v0  ;;  %463 = vset.pattern.permute.xlu1 %v548_v1  ;;  %v193_v5 = vlaneseq  ;;  %v185_v11 = vld [vmem:[%s154_s17] sm:$0xff]  ;;  %p178_p7 = scmp.lt.s32.totalorder %s536_s12, 1  ;;  %vm294_vm0 = vcmask 7168   ;;  %vm301_vm1 = vcmask 15368  }
  0x27   : > { %189 = vperm.xlu0 %461, %v186_v2   ;;  %240 = vperm.xlu1 %463, %v186_v2  }
  0x28   : > { %v194_v6 = vshrl.u32 %v193_v5, 7  ;;  %s683_s12 = smov (!%p178_p7, %s536_s12), 1 }
  0x29   : > { %s398_s20 = sshll.u32 %s683_s12, 3 }
  0x2a   : > { %v195_v7 = vsub.s32 0, %v194_v6  ;;  %v199_v8 = vsub.s32 4, %v194_v6  ;;  %v219_v9 = vsub.s32 1, %v194_v6  ;;  %v223_v10 = vsub.s32 5, %v194_v6  ;;  %s184_s24 = scalar_lea.vmem %s671_s2, %s398_s20 }
  0x2b   : > { %462 = vset.pattern.permute.xlu0 %v549_v3  ;;  %464 = vset.pattern.permute.xlu1 %v550_v4  ;;  %v245_v12 = vsub.s32 2, %v194_v6  ;;  %v249_v13 = vsub.s32 6, %v194_v6  ;;  %v271_v14 = vsub.s32 3, %v194_v6  ;;  %v275_v15 = vsub.s32 7, %v194_v6 }
  0x2c   : > { %214 = vperm.xlu0 %462, %v186_v2   ;;  %266 = vperm.xlu1 %464, %v186_v2   ;;  %v196_v16 = vrot.slane %v185_v11, %v195_v7  ;;  %v200_v17 = vrot.slane %v185_v11, %v199_v8  ;;  %v220_v18 = vrot.slane %v185_v11, %v219_v9 }
  0x2d   : > { %v224_v19 = vrot.slane %v185_v11, %v223_v10  ;;  %v246_v20 = vrot.slane %v185_v11, %v245_v12  ;;  %v250_v21 = vrot.slane %v185_v11, %v249_v13  ;;  %v272_v24 = vrot.slane %v185_v11, %v271_v14 }
  0x2e   : > { %v276_v25 = vrot.slane %v185_v11, %v275_v15  ;;  %v206_v26 = vrot.slane %v196_v16, %v195_v7  ;;  %v210_v27 = vrot.slane %v200_v17, %v195_v7  ;;  %v230_v28 = vrot.slane %v220_v18, %v219_v9 }
  0x2f   : > { %v234_v29 = vrot.slane %v224_v19, %v219_v9  ;;  %v256_v30 = vrot.slane %v246_v20, %v245_v12  ;;  %v260_v31 = vrot.slane %v250_v21, %v245_v12  ;;  %v282_v32 = vrot.slane %v272_v24, %v271_v14 }
  0x30   : > { %465 = vset.pattern.permute.xlu0 %v550_v4  ;;  %v286_v33 = vrot.slane %v276_v25, %v271_v14 }
  0xa2   : > { %v190_v22 = vpop.permute.xlu0 %189  ;;  %v241_v23 = vpop.permute.xlu1 %240 }
  0xa3   : > { %v211_v36 = vmul.f32 %v206_v26, %v190_v22  ;;  %v212_v37 = vmul.f32 %v210_v27, %v190_v22  ;;  %v261_v40 = vmul.f32 %v256_v30, %v241_v23  ;;  %v262_v41 = vmul.f32 %v260_v31, %v241_v23 }
  0xa7   : > { %v215_v34 = vpop.permute.xlu0 %214  ;;  %v267_v35 = vpop.permute.xlu1 %266 }
  0xa8   : > { %v235_v38 = vmul.f32 %v230_v28, %v215_v34  ;;  %v236_v39 = vmul.f32 %v234_v29, %v215_v34  ;;  %v287_v44 = vmul.f32 %v282_v32, %v267_v35  ;;  %v288_v45 = vmul.f32 %v286_v33, %v267_v35 }
  0xaa   : > { %v237_v42 = vadd.f32 %v235_v38, %v211_v36  ;;  %v238_v43 = vadd.f32 %v236_v39, %v212_v37 }
  0xac   : > { %v263_v46 = vadd.f32 %v261_v40, %v237_v42  ;;  %v264_v47 = vadd.f32 %v262_v41, %v238_v43 }
  0xae   : > { %v289_v48 = vadd.f32 %v287_v44, %v263_v46  ;;  %v290_v49 = vadd.f32 %v288_v45, %v264_v47 }
  0xb0   : > { %v291_v50 = vadd.f32 %v290_v49, %v289_v48  ;;  %v296_v51 = vmul.f32 %v289_v48, %v289_v48  ;;  %v297_v52 = vmul.f32 %v290_v49, %v290_v49 }
  0xb2   : > { %292 = vadd.xlane.f32.xlu1 %v291_v50  ;;  %v298_v53 = vadd.f32 %v297_v52, %v296_v51 }
  0xb4   : > { %299 = vadd.xlane.f32.xlu0 %v298_v53 }
 0x13b   : > { %v293_v54 = vpop.xlane.xlu1 %292 }
 0x13c   : > { %295 = vst.msk [vmem:[%s184_s24] sm:$0xff] %vm294_vm0, %v293_v54 }
 0x13d   : > { %v300_v55 = vpop.xlane.xlu0 %299 }
 0x13e   : > { %302 = vst.msk [vmem:[%s184_s24] sm:$0xff] %vm301_vm1, %v300_v55 }
 0x13f PF: > { %s15_s14 = sadd.s32 1, %s544_s14   ;;  %s675_s9 = smov %s528_s10 }
 0x140   : > { %p12_p8 = scmp.ge.s32.totalorder %s15_s14, 4   ;;  %s676_s10 = smov %s532_s11 }
 0x141   : > { %s677_s11 = smov %s615_s21  ;;  %s678_s12 = smov %s540_s13 }
 0x142   : > { %s679_s13 = smov %s681_s16  ;;  %14 = sbr.rel (!%p12_p8) target bundleno = 4 (0x4), region = 68 }
 0x147   :  { %328 = vsyncpa [#allocation3], 1 }
 0x148   :  { %330 = vsyncpa [#allocation3 + $0x1], 1 }

</bundles_post_ra>
